<compile_context>
chip_gen: v5e
topology: v5e:2x2
jax: 0.10.0
libtpu: 0.0.40
codegen_flags: <defaults>
</compile_context>

<pallas_src>
import functools

import jax
import jax.numpy as jnp
from jax import lax
from jax.experimental import pallas as pl
from jax.experimental.pallas import tpu as pltpu


def _round_up(x: int, m: int) -> int:
    return -(-x // m) * m


def _detect_vmem_limit_bytes() -> int:
    """Per-generation pipeline VMEM limit (v7x -> 32 MiB, v5e/v6e -> 64 MiB)."""
    cap = 64 * 1024 * 1024  # conservative fallback (v7x per-TC capacity)
    try:  # trace-time hardware query; guarded so a missing API can't break us
        cap = int(pltpu.get_tpu_info().vmem_capacity_bytes)
    except Exception:
        pass
    return max(16 * 1024 * 1024, min(cap // 2, 64 * 1024 * 1024))


_VMEM_LIMIT = _detect_vmem_limit_bytes()
_MAX_TM = 16384          # sanity cap on rows per tile
_BUDGET_FRACTION = 0.6   # fraction of the VMEM limit handed to the pipeline


def _make_recon_loss_kernel(loss_type, tm, D, N, steps, last, needs_tail_mask):
    nsub = tm // 8

    def kernel(p_ref, t_ref, m_ref, out_ref):
        j = pl.program_id(1)

        @pl.when(j == 0)
        def _init():
            out_ref[...] = jnp.zeros_like(out_ref)

        m = m_ref[...].astype(jnp.float32)                              # (tm, 1)
        diff = (p_ref[...].astype(jnp.float32)
                - t_ref[...].astype(jnp.float32)) * m                   # fused mask

        if loss_type == "L1Loss":
            elem = jnp.abs(diff)
        elif loss_type == "SmoothL1Loss":
            a = jnp.abs(diff)
            elem = jnp.where(a < 1.0, 0.5 * diff * diff, a - 0.5)
        elif loss_type == "MSELoss":
            elem = diff * diff
        else:
            raise NotImplementedError(loss_type)

        if needs_tail_mask:
            # Ragged tail / duplicated (clamped) tiles: zero invalid rows with a
            # select so garbage (possibly NaN/Inf) in the partial block can't
            # leak into the sum.
            idx = pl.program_id(0) * steps + j
            row0 = jnp.minimum(idx, last) * tm
            rows = lax.broadcasted_iota(jnp.int32, (tm, D), 0) + row0
            valid = jnp.logical_and(rows < N, idx <= last)
            elem = jnp.where(valid, elem, 0.0)

        # (tm, D) -> (tm//8, 8, D) is a layout-preserving split of the sublane
        # axis; the axis-0 reduce is plain vreg-wise VPU adds into the resident
        # per-core output block (no per-step scalar RMW, no extra HBM traffic).
        out_ref[...] += jnp.sum(elem.reshape(nsub, 8, D), axis=0)

    return kernel


@functools.partial(jax.jit, static_argnames=("loss_type", "row_tile"))
def recon_loss(pred, target, mask, *, loss_type: str = "L1Loss", row_tile=None):
    """pred, target: (B, S, D); mask: (B, S). Returns scalar f32 loss."""
    eps = 1e-6
    B, S, D = pred.shape
    N = B * S

    # Denominator = sum of the d-expanded mask (+ eps); tiny, do it in XLA.
    denom = jnp.sum(mask.astype(jnp.float32)) * jnp.float32(D) + jnp.float32(eps)

    pred2 = pred.reshape(N, D)
    target2 = target.reshape(N, D)

    itemsize = max(pred.dtype.itemsize, target.dtype.itemsize)
    D_pad = _round_up(D, 128)        # lane-padded width as stored / DMA'd on TPU

    # ---- row-tile selection against an explicit per-generation VMEM budget ----
    if row_tile is None:
        # Per-row VMEM: 2 data streams x 2 pipeline buffers (native dtype),
        # ~2 f32 temporaries (diff / elem), 2 buffers of the int8 mask column
        # (lane-padded to 128).
        per_row = 2 * 2 * D_pad * itemsize + 2 * D_pad * 4 + 2 * 128
        tm = int(_VMEM_LIMIT * _BUDGET_FRACTION) // per_row
    else:
        tm = int(row_tile)
        assert tm > 0 and tm % 32 == 0, "row_tile must be a positive multiple of 32"
    tm = min(tm, _MAX_TM, _round_up(N, 32))
    tm = max(32, tm // 32 * 32)      # multiple of 32 keeps the int8 mask block legal

    total_tiles = -(-N // tm)
    ncores = 2 if total_tiles >= 2 else 1     # leading "parallel" axis (v7x megacore)
    steps = -(-total_tiles // ncores)
    needs_tail_mask = (N % tm != 0) or (ncores * steps != total_tiles)
    last = total_tiles - 1

    # Mask: binary 0/1 missing-data mask -> int8 stream (4x less lane-padded
    # traffic / VMEM than f32); only this tiny array is padded.
    # TODO(synk): keep the mask in f32 here if fractional mask weights are ever used.
    R_pad = ncores * steps * tm
    mask_i8 = mask.reshape(N).astype(jnp.int8)
    if R_pad != N:
        mask_i8 = jnp.pad(mask_i8, (0, R_pad - N))
    mask_i8 = mask_i8.reshape(R_pad, 1)

    def row_block(c, j):
        # Clamp so the (possible) trailing tile of core 1 never maps fully OOB;
        # its contribution is zeroed in-kernel via the validity select.
        return (jnp.minimum(c * steps + j, last), 0)

    kernel = _make_recon_loss_kernel(loss_type, tm, D, N, steps, last, needs_tail_mask)

    cost = pl.CostEstimate(
        flops=4 * N * D,
        transcendentals=0,
        bytes_accessed=int(2 * total_tiles * tm * D_pad * itemsize   # pred + target (lane-padded)
                           + R_pad * 128                             # int8 mask column
                           + ncores * 8 * D_pad * 4),                # partial-sum writeback
    )

    partial = pl.pallas_call(
        kernel,
        out_shape=jax.ShapeDtypeStruct((ncores * 8, D), jnp.float32),
        grid=(ncores, steps),
        in_specs=[
            pl.BlockSpec((tm, D), row_block),   # pred   (native dtype, no pre-pass)
            pl.BlockSpec((tm, D), row_block),   # target (native dtype, no pre-pass)
            pl.BlockSpec((tm, 1), row_block),   # int8 mask column
        ],
        out_specs=pl.BlockSpec((8, D), lambda c, j: (c, 0)),
        compiler_params=pltpu.CompilerParams(
            dimension_semantics=("parallel", "arbitrary"),
            vmem_limit_bytes=_VMEM_LIMIT,
        ),
        cost_estimate=cost,
    )(pred2, target2, mask_i8)

    return jnp.sum(partial) / denom


def _reference(pred, target, mask, loss_type):
    eps = 1e-6
    m = jnp.broadcast_to(mask[..., None].astype(jnp.float32), pred.shape)
    p = pred.astype(jnp.float32) * m
    t = target.astype(jnp.float32) * m
    diff = p - t
    if loss_type == "L1Loss":
        elem = jnp.abs(diff)
    elif loss_type == "SmoothL1Loss":
        a = jnp.abs(diff)
        elem = jnp.where(a < 1.0, 0.5 * diff * diff, a - 0.5)
    else:
        elem = diff * diff
    return jnp.sum(elem) / (jnp.sum(m) + eps)


if __name__ == "__main__":
    root = jax.random.PRNGKey(0)
    ok = True

    def _check(idx, B, S, D, loss_type, row_tile=None):
        k1, k2, k3 = jax.random.split(jax.random.fold_in(root, idx), 3)
        pred = jax.random.normal(k1, (B, S, D), dtype=jnp.float32)
        target = jax.random.normal(k2, (B, S, D), dtype=jnp.float32)
        mask = (jax.random.uniform(k3, (B, S)) > 0.3).astype(jnp.float32)
        out = jax.block_until_ready(
            recon_loss(pred, target, mask, loss_type=loss_type, row_tile=row_tile))
        ref = _reference(pred, target, mask, loss_type)
        good = bool(jnp.allclose(out, ref, rtol=1e-5, atol=1e-6))
        if not good:
            print(f"MISMATCH {loss_type} B={B} S={S} D={D} tile={row_tile}: "
                  f"kernel={out} ref={ref}")
        return good

    # Primary small shape from the module contract (batch=2, seq=8, d=32).
    for i, lt in enumerate(("L1Loss", "SmoothL1Loss", "MSELoss")):
        ok &= _check(i, 2, 8, 32, lt)
    # Multi-step accumulation + 2-core "parallel" row split (N=256, tm=64).
    ok &= _check(3, 4, 64, 32, "SmoothL1Loss", row_tile=64)
    # Odd tile count -> clamped duplicate tile on core 1 (N=96, tm=32 -> 3 tiles).
    ok &= _check(4, 2, 48, 32, "MSELoss", row_tile=32)
    # Ragged tail (N=21, not a multiple of the tile) handled in-kernel.
    ok &= _check(5, 3, 7, 32, "L1Loss")
    # Wider feature dim (multiple of 128, no lane padding).
    ok &= _check(6, 2, 8, 256, "MSELoss")

    if ok:
        print("KERNEL_OK")
</pallas_src>

<mosaic_0001>
module attributes {stable_mosaic.version = 11 : i64} {
  func.func @kernel(%arg0: i32, %arg1: i32, %arg2: memref<32x32xf32, #tpu.memory_space<vmem>>, %arg3: memref<32x32xf32, #tpu.memory_space<vmem>>, %arg4: memref<32x1xi8, #tpu.memory_space<vmem>>, %arg5: memref<8x32xf32, #tpu.memory_space<vmem>>) attributes {dimension_semantics = [#tpu.dimension_semantics<parallel>, #tpu.dimension_semantics<arbitrary>], iteration_bounds = array<i64: 1, 1>, scalar_prefetch = 0 : i64, scratch_operands = 0 : i64, tpu.core_type = #tpu.core_type<tc>, window_params = [{transform_indices = @transform_0, window_bounds = array<i64: 32, 32>}, {transform_indices = @transform_1, window_bounds = array<i64: 32, 32>}, {transform_indices = @transform_2, window_bounds = array<i64: 32, 1>}, {transform_indices = @transform_3, window_bounds = array<i64: 8, 32>}]} {
    %c0_i32 = arith.constant 0 : i32
    %0 = arith.cmpi eq, %arg1, %c0_i32 : i32
    %1 = arith.extui %0 : i1 to i32
    %c0_i32_0 = arith.constant 0 : i32
    %2 = arith.cmpi ne, %1, %c0_i32_0 : i32
    scf.if %2 {
      %cst_13 = arith.constant 0.000000e+00 : f32
      %30 = vector.broadcast %cst_13 : f32 to vector<8x32xf32>
      %c0_14 = arith.constant 0 : index
      %c0_15 = arith.constant 0 : index
      %31 = vector.load %arg5[%c0_14, %c0_15] : memref<8x32xf32, #tpu.memory_space<vmem>>, vector<8x32xf32>
      tpu.vector_store %arg5[%c0_14, %c0_15], %30 {strides = array<i32>} : memref<8x32xf32, #tpu.memory_space<vmem>>, vector<8x32xf32>,
    } else {
    }
    %c0 = arith.constant 0 : index
    %c0_1 = arith.constant 0 : index
    %3 = vector.load %arg4[%c0, %c0_1] : memref<32x1xi8, #tpu.memory_space<vmem>>, vector<32x1xi8>
    %4 = arith.sitofp %3 : vector<32x1xi8> to vector<32x1xf32>
    %c0_2 = arith.constant 0 : index
    %c0_3 = arith.constant 0 : index
    %5 = vector.load %arg2[%c0_2, %c0_3] : memref<32x32xf32, #tpu.memory_space<vmem>>, vector<32x32xf32>
    %c0_4 = arith.constant 0 : index
    %c0_5 = arith.constant 0 : index
    %6 = vector.load %arg3[%c0_4, %c0_5] : memref<32x32xf32, #tpu.memory_space<vmem>>, vector<32x32xf32>
    %7 = arith.subf %5, %6 : vector<32x32xf32>
    %8 = vector.broadcast %4 : vector<32x1xf32> to vector<32x32xf32>
    %9 = arith.mulf %7, %8 : vector<32x32xf32>
    %10 = math.absf %9 : vector<32x32xf32>
    %c1_i32 = arith.constant 1 : i32
    %11 = arith.muli %arg0, %c1_i32 : i32
    %12 = arith.addi %11, %arg1 : i32
    %c0_i32_6 = arith.constant 0 : i32
    %13 = arith.minsi %12, %c0_i32_6 : i32
    %c32_i32 = arith.constant 32 : i32
    %14 = arith.muli %13, %c32_i32 : i32
    %15 = tpu.iota {dimensions = array<i32: 0>} : vector<32x32xi32>
    %16 = vector.broadcast %14 : i32 to vector<32x32xi32>
    %17 = arith.addi %15, %16 : vector<32x32xi32>
    %c16_i32 = arith.constant 16 : i32
    %18 = vector.broadcast %c16_i32 : i32 to vector<32x32xi32>
    %19 = arith.cmpi slt, %17, %18 : vector<32x32xi32>
    %c0_i32_7 = arith.constant 0 : i32
    %20 = arith.cmpi sle, %12, %c0_i32_7 : i32
    %21 = vector.broadcast %20 : i1 to vector<32x32xi1>
    %22 = arith.andi %19, %21 : vector<32x32xi1>
    %cst = arith.constant 0.000000e+00 : f32
    %23 = vector.broadcast %cst : f32 to vector<32x32xf32>
    %24 = arith.select %22, %10, %23 : vector<32x32xi1>, vector<32x32xf32>
    %c0_8 = arith.constant 0 : index
    %c0_9 = arith.constant 0 : index
    %25 = vector.load %arg5[%c0_8, %c0_9] : memref<8x32xf32, #tpu.memory_space<vmem>>, vector<8x32xf32>
    %26 = vector.shape_cast %24 : vector<32x32xf32> to vector<4x8x32xf32>
    %cst_10 = arith.constant dense<0.000000e+00> : vector<8x32xf32>
    %27 = vector.multi_reduction <add>, %26, %cst_10 [0] : vector<4x8x32xf32> to vector<8x32xf32>
    %28 = arith.addf %25, %27 : vector<8x32xf32>
    %c0_11 = arith.constant 0 : index
    %c0_12 = arith.constant 0 : index
    %29 = vector.load %arg5[%c0_11, %c0_12] : memref<8x32xf32, #tpu.memory_space<vmem>>, vector<8x32xf32>
    tpu.vector_store %arg5[%c0_11, %c0_12], %28 {strides = array<i32>} : memref<8x32xf32, #tpu.memory_space<vmem>>, vector<8x32xf32>,
    return
  }
  func.func @transform_0(%arg0: i32, %arg1: i32) -> (i32, i32) {
    %c1_i32 = arith.constant 1 : i32
    %0 = arith.muli %arg0, %c1_i32 : i32
    %1 = arith.addi %0, %arg1 : i32
    %c0_i32 = arith.constant 0 : i32
    %2 = arith.minsi %1, %c0_i32 : i32
    %c0_i32_0 = arith.constant 0 : i32
    %c0_i32_1 = arith.constant 0 : i32
    return %2, %c0_i32_0 : i32, i32
  }
  func.func @transform_1(%arg0: i32, %arg1: i32) -> (i32, i32) {
    %c1_i32 = arith.constant 1 : i32
    %0 = arith.muli %arg0, %c1_i32 : i32
    %1 = arith.addi %0, %arg1 : i32
    %c0_i32 = arith.constant 0 : i32
    %2 = arith.minsi %1, %c0_i32 : i32
    %c0_i32_0 = arith.constant 0 : i32
    %c0_i32_1 = arith.constant 0 : i32
    return %2, %c0_i32_0 : i32, i32
  }
  func.func @transform_2(%arg0: i32, %arg1: i32) -> (i32, i32) {
    %c1_i32 = arith.constant 1 : i32
    %0 = arith.muli %arg0, %c1_i32 : i32
    %1 = arith.addi %0, %arg1 : i32
    %c0_i32 = arith.constant 0 : i32
    %2 = arith.minsi %1, %c0_i32 : i32
    %c0_i32_0 = arith.constant 0 : i32
    %c0_i32_1 = arith.constant 0 : i32
    return %2, %c0_i32_0 : i32, i32
  }
  func.func @transform_3(%arg0: i32, %arg1: i32) -> (i32, i32) {
    %c0_i32 = arith.constant 0 : i32
    %c0_i32_0 = arith.constant 0 : i32
    return %arg0, %c0_i32 : i32, i32
  }
}

</mosaic_0001>

<bundles_post_ra>
// kernel: recon_loss.1
= control target key start
LH: loop header
LB: loop body
LE: loop exit
PB: predicated region body
PF: predicated region fallthrough
CT: control target
= control target key end

     0   :  { %8 = vsyncpa [#allocation3], 0  ;;  %s325_s0 = inlined_call_operand.vmem [shape: f32[16,32], index: 0, kind: input, shape index: {}]   ;;  %s326_s1 = inlined_call_operand.hbm [shape: f32[16,32], index: 1, kind: input, shape index: {}]   ;;  %s327_s2 = inlined_call_operand.vmem [shape: s8[32,1], index: 2, kind: input, shape index: {}]   ;;  %s328_s3 = inlined_call_operand.vmem [shape: f32[8,32], index: 3, kind: output, shape index: {}]  }
   0x1   :  { %37 = vsyncadd [#allocation3], 256  ;;  %s42_s14 = sshll.u32 %s326_s1, 4  ;;  %s275_s15 = smov [#allocation2]   ;;  %s43_s14 = int_to_ptr.hbm [resolvable:$true] %s42_s14 }
   0x2   :  { %s44_s16 = sshll.u32 %s275_s15, 4  ;;  %s276_s17 = smov 128   ;;  %s45_s16 = int_to_ptr.vmem [resolvable:$true] %s44_s16 }
   0x3   :  { %s277_s18 = smov 8  }
   0x4   :  { %50 = dma.hbm_to_vmem [thread:$0]  %s43_s14, 256, %s45_s16, [#allocation3], %s276_s17, %s276_s17, %s277_s18  }
   0x5   :  { %273 = dma.done.wait [#allocation3], 512  }
   0x6   :  { %274 = vsyncadd [#allocation3], 4294966784  ;;  %vm125_vm0 = vcmask 261120   ;;  %v278_v0 = vmov 0   ;;  %v279_v1 = vmov 0.0   ;;  %v139_v7 = vld [vmem:[%s325_s0] sm:$0xff] }
   0x7   :  { %248 = vset.pattern.permute.xlu0 %v278_v0  ;;  %126 = vst.msk [vmem:[%s328_s3] sm:$0xff] %vm125_vm0, %v279_v1  ;;  %v240_v2 = vld [vmem:[%s327_s2] sm:$0xf]   ;;  %v140_v11 = vld [vmem:[%s325_s0 + $0x8] sm:$0xff] }
   0x8   :  { %v241_v3 = vunpack.c.0.s8 %v240_v2  ;;  %v242_v5 = vunpack.c.1.s8 %v240_v2  ;;  %v143_v8 = vld [vmem:[#allocation2] sm:$0xff]  ;;  %v144_v12 = vld [vmem:[#allocation2 + $0x8] sm:$0xff] }
   0x9   :  { %v147_v10 = vsub.f32 %v139_v7, %v143_v8  ;;  %v148_v14 = vsub.f32 %v140_v11, %v144_v12 }
   0xa   :  { %v135_v4 = vcvt.s32.f32 %v241_v3  ;;  %v136_v6 = vcvt.s32.f32 %v242_v5 }
   0xc   :  { %153 = vperm.xlu0 %248, %v135_v4  }
   0xe   :  { %v209_v20 = vld [vmem:[%s328_s3] sm:$0xff] }
  0x14   :  { %158 = vperm.xlu0 %248, %v136_v6  }
  0x7e   :  { %v154_v9 = vpop.permute.xlu0 %153 }
  0x7f   :  { %v171_v13 = vmul.f32 %v154_v9, %v147_v10 }
  0x81   :  { %v175_v16 = vand.u32 2147483647, %v171_v13 }
  0x83   :  { %v211_v19 = vsel %vm125_vm0, %v175_v16, 0.0 }
  0x86   :  { %v159_v15 = vpop.permute.xlu0 %158 }
  0x87   :  { %v172_v17 = vmul.f32 %v159_v15, %v148_v14 }
  0x89   :  { %v176_v18 = vand.u32 2147483647, %v172_v17 }
  0x8b   :  { %v212_v21 = vsel %vm125_vm0, %v176_v18, 0.0 }
  0x8c   :  { %v213_v22 = vadd.f32 %v212_v21, %v211_v19 }
  0x8e   :  { %v218_v23 = vadd.f32 %v213_v22, %v209_v20 }
  0x90   :  { %219 = vst.msk [vmem:[%s328_s3] sm:$0xff] %vm125_vm0, %v218_v23 }
  0x91   :  { %224 = vsyncpa [#allocation3], 1 }

</bundles_post_ra>
